<compile_context>
chip_gen: v7x
topology: tpu7x:2x2x1
jax: 0.10.0
libtpu: 0.0.40
codegen_flags: <defaults>
</compile_context>

<pallas_src>
import functools

import jax
import jax.numpy as jnp
from jax.experimental import pallas as pl
from jax.experimental.pallas import tpu as pltpu

EPS = 1e-4
MOMENTUM = 0.9

# Target bytes of `x` per grid step (measured sweeps put the HBM-roofline knee
# at multi-hundred-KiB..MiB blocks; 2 MiB leaves room for double buffering).
_TARGET_BLOCK_BYTES = 2 * 1024 * 1024


@functools.lru_cache(maxsize=1)
def _vmem_limit_bytes():
    """Per-generation scoped-VMEM limit: ~5/8 of physical capacity."""
    try:
        cap = int(pltpu.get_tpu_info().vmem_capacity_bytes)
    except Exception:  # not queryable -> be conservative (safe on v7x's 64 MiB)
        cap = 64 * 1024 * 1024
    return (cap * 5) // 8


def _mosaic_params(semantics):
    return pltpu.CompilerParams(dimension_semantics=semantics,
                                vmem_limit_bytes=_vmem_limit_bytes())


def _divisible_block(total, align, max_elems):
    """Largest multiple of `align` dividing `total` that is <= max_elems.
    Falls back to the full extent if no such divisor exists."""
    best = None
    cap = min(total, max_elems)
    for d in range(align, cap + 1, align):
        if total % d == 0:
            best = d
    return best if best is not None else total


# TODO(synk): when HW % 128 != 0 (e.g. 7x7 feature maps) fold a channel factor
# into the lane axis so vregs are lane-dense; correctness is unaffected today,
# only lane occupancy.
def _choose_tiles_nchw(N, C, HW, itemsize, target=_TARGET_BLOCK_BYTES):
    """Pick (n_blk, c_blk, hw_blk) so one x block is ~`target` bytes."""
    # Lane axis (HW): multiples of 128; full extent if HW has no 128-divisor.
    max_lane = max(128, target // max(1, C * itemsize))
    hw_blk = _divisible_block(HW, 128, max_lane)
    # Channel axis: only block when a full-C slab over hw_blk busts the target.
    if C * hw_blk * itemsize > target:
        max_c = max(8, target // max(1, hw_blk * itemsize))
        c_blk = _divisible_block(C, 8, max_c)
    else:
        c_blk = C
    # Batch axis: merge samples when one (c_blk, hw_blk) slab is well below target.
    per_sample = c_blk * hw_blk * itemsize
    if per_sample * 2 <= target:
        n_blk = _divisible_block(N, 1, max(1, target // per_sample))
    else:
        n_blk = 1
    return n_blk, c_blk, hw_blk


def _choose_tile_nc(N, C, itemsize, target=_TARGET_BLOCK_BYTES):
    max_n = max(8, target // max(1, C * itemsize))
    return _divisible_block(N, 8, max_n)


# ----------------------------- kernels ---------------------------------------

def _stats_nchw_kernel(x_ref, shift_ref, psum_ref, psq_ref):
    # x: (n_blk, c_blk, hw_blk); shift: (1, c_blk, 1); psum/psq: (1, 1, c_blk, 1)
    @pl.when(pl.program_id(3) == 0)
    def _():
        psum_ref[...] = jnp.zeros_like(psum_ref)
        psq_ref[...] = jnp.zeros_like(psq_ref)

    xc = x_ref[...].astype(jnp.float32) - shift_ref[...]
    c_blk = xc.shape[1]

    def _reduce(v):
        r = jnp.sum(v, axis=2, keepdims=True)   # cross-lane reduce (XLU; hidden under DMA)
        r = jnp.sum(r, axis=0, keepdims=True)   # leading-dim vadds
        return r.reshape(1, 1, c_blk, 1)

    psum_ref[...] += _reduce(xc)
    psq_ref[...] += _reduce(xc * xc)


def _stats_nc_kernel(x_ref, shift_ref, psum_ref, psq_ref):
    # x: (n_blk, C); shift: (1, C); psum/psq: (1, 1, C)
    @pl.when(pl.program_id(1) == 0)
    def _():
        psum_ref[...] = jnp.zeros_like(psum_ref)
        psq_ref[...] = jnp.zeros_like(psq_ref)

    xc = x_ref[...].astype(jnp.float32) - shift_ref[...]
    C = xc.shape[1]
    psum_ref[...] += jnp.sum(xc, axis=0, keepdims=True).reshape(1, 1, C)
    psq_ref[...] += jnp.sum(xc * xc, axis=0, keepdims=True).reshape(1, 1, C)


def _affine_kernel(x_ref, scale_ref, bias_ref, y_ref):
    # y = x * scale + bias ; scale/bias broadcast along the channel axis.
    x = x_ref[...].astype(jnp.float32)
    y_ref[...] = (x * scale_ref[...] + bias_ref[...]).astype(y_ref.dtype)


def _fused_train_kernel(x_ref, gamma_ref, beta_ref, y_ref, mean_ref, std_ref, *, eps):
    # Whole activation resident in VMEM: proper two-pass mean/var (best
    # numerics) plus the normalize, at 1 HBM read + 1 HBM write.
    x = x_ref[...].astype(jnp.float32)
    if x.ndim == 3:                        # (N, C, HW)
        cnt = x.shape[0] * x.shape[2]

        def _reduce(v):
            return jnp.sum(jnp.sum(v, axis=2, keepdims=True), axis=0, keepdims=True)
    else:                                   # (N, C)
        cnt = x.shape[0]

        def _reduce(v):
            return jnp.sum(v, axis=0, keepdims=True)

    mean = _reduce(x) / cnt
    xc = x - mean
    # torch .std() default is unbiased (cnt-1); cnt==1 gives inf/NaN like the reference.
    var = _reduce(xc * xc) / jnp.float32(cnt - 1)
    std = jnp.sqrt(var)
    mean_ref[...] = mean
    std_ref[...] = std
    scale = gamma_ref[...] / (std + eps)
    y_ref[...] = (xc * scale + beta_ref[...]).astype(y_ref.dtype)


# ----------------------------- wrappers ---------------------------------------

def _stats_nchw(x3, shift):
    """x3: (N, C, HW), shift: (1, C, 1) f32 -> (psum, psq), each (NB, P, C, 1) f32."""
    N, C, HW = x3.shape
    itemsize = x3.dtype.itemsize
    n_blk, c_blk, hw_blk = _choose_tiles_nchw(N, C, HW, itemsize)
    NB, nC, nHW = N // n_blk, C // c_blk, HW // hw_blk
    # Give the pass a parallel axis even when NB*nC == 1 (v7x: 2 TensorCores).
    P = 2 if (NB * nC == 1 and nHW >= 2 and nHW % 2 == 0) else 1
    Hin = nHW // P

    acc_spec = pl.BlockSpec((1, 1, c_blk, 1), lambda n, c, p, h: (n, p, c, 0))
    elems = N * C * HW
    cost = pl.CostEstimate(flops=int(4 * elems), transcendentals=0,
                           bytes_accessed=int(elems * itemsize + 2 * NB * P * C * 4))
    return pl.pallas_call(
        _stats_nchw_kernel,
        out_shape=(jax.ShapeDtypeStruct((NB, P, C, 1), jnp.float32),
                   jax.ShapeDtypeStruct((NB, P, C, 1), jnp.float32)),
        grid=(NB, nC, P, Hin),
        in_specs=[pl.BlockSpec((n_blk, c_blk, hw_blk),
                               lambda n, c, p, h: (n, c, p * Hin + h)),
                  pl.BlockSpec((1, c_blk, 1), lambda n, c, p, h: (0, c, 0))],
        out_specs=(acc_spec, acc_spec),
        compiler_params=_mosaic_params(("parallel", "parallel", "parallel", "arbitrary")),
        cost_estimate=cost,
    )(x3, shift)


def _affine_nchw(x3, scale, bias):
    """x3: (N, C, HW), scale/bias: (1, C, 1) f32 -> y3: (N, C, HW) in x3.dtype."""
    N, C, HW = x3.shape
    itemsize = x3.dtype.itemsize
    n_blk, c_blk, hw_blk = _choose_tiles_nchw(N, C, HW, itemsize)
    grid = (N // n_blk, C // c_blk, HW // hw_blk)
    elems = N * C * HW
    cost = pl.CostEstimate(flops=int(2 * elems), transcendentals=0,
                           bytes_accessed=int(2 * elems * itemsize + 2 * C * 4))
    x_spec = pl.BlockSpec((n_blk, c_blk, hw_blk), lambda n, c, h: (n, c, h))
    p_spec = pl.BlockSpec((1, c_blk, 1), lambda n, c, h: (0, c, 0))
    return pl.pallas_call(
        _affine_kernel,
        out_shape=jax.ShapeDtypeStruct((N, C, HW), x3.dtype),
        grid=grid,
        in_specs=[x_spec, p_spec, p_spec],
        out_specs=x_spec,
        compiler_params=_mosaic_params(("parallel", "parallel", "parallel")),
        cost_estimate=cost,
    )(x3, scale, bias)


def _stats_nc(x2, shift):
    """x2: (N, C), shift: (1, C) f32 -> (psum, psq), each (P, 1, C) f32."""
    N, C = x2.shape
    itemsize = x2.dtype.itemsize
    n_blk = _choose_tile_nc(N, C, itemsize)
    nN = N // n_blk
    P = 2 if (nN >= 2 and nN % 2 == 0) else 1
    Nin = nN // P

    acc_spec = pl.BlockSpec((1, 1, C), lambda p, i: (p, 0, 0))
    cost = pl.CostEstimate(flops=int(4 * N * C), transcendentals=0,
                           bytes_accessed=int(N * C * itemsize + 2 * P * C * 4))
    return pl.pallas_call(
        _stats_nc_kernel,
        out_shape=(jax.ShapeDtypeStruct((P, 1, C), jnp.float32),
                   jax.ShapeDtypeStruct((P, 1, C), jnp.float32)),
        grid=(P, Nin),
        in_specs=[pl.BlockSpec((n_blk, C), lambda p, i: (p * Nin + i, 0)),
                  pl.BlockSpec((1, C), lambda p, i: (0, 0))],
        out_specs=(acc_spec, acc_spec),
        compiler_params=_mosaic_params(("parallel", "arbitrary")),
        cost_estimate=cost,
    )(x2, shift)


def _affine_nc(x2, scale, bias):
    """x2: (N, C), scale/bias: (1, C) f32 -> y: (N, C) in x2.dtype."""
    N, C = x2.shape
    itemsize = x2.dtype.itemsize
    n_blk = _choose_tile_nc(N, C, itemsize)
    cost = pl.CostEstimate(flops=int(2 * N * C), transcendentals=0,
                           bytes_accessed=int(2 * N * C * itemsize + 2 * C * 4))
    return pl.pallas_call(
        _affine_kernel,
        out_shape=jax.ShapeDtypeStruct((N, C), x2.dtype),
        grid=(N // n_blk,),
        in_specs=[pl.BlockSpec((n_blk, C), lambda i: (i, 0)),
                  pl.BlockSpec((1, C), lambda i: (0, 0)),
                  pl.BlockSpec((1, C), lambda i: (0, 0))],
        out_specs=pl.BlockSpec((n_blk, C), lambda i: (i, 0)),
        compiler_params=_mosaic_params(("parallel",)),
        cost_estimate=cost,
    )(x2, scale, bias)


def _fused_fits(xv):
    # ~8x working set: double-buffered in/out blocks plus f32 temporaries.
    return xv.size * 4 * 8 <= _vmem_limit_bytes()


def _fused_train(xv, gamma_v, beta_v, eps):
    """Single-pass train-mode BN for activations that fit in VMEM."""
    nd = xv.ndim
    zeros = (0,) * nd
    x_spec = pl.BlockSpec(xv.shape, lambda i: zeros)
    p_spec = pl.BlockSpec(gamma_v.shape, lambda i: zeros)
    elems = xv.size
    C = gamma_v.size
    cost = pl.CostEstimate(flops=int(7 * elems), transcendentals=int(C),
                           bytes_accessed=int(2 * elems * xv.dtype.itemsize + 4 * C * 4))
    return pl.pallas_call(
        functools.partial(_fused_train_kernel, eps=eps),
        out_shape=(jax.ShapeDtypeStruct(xv.shape, xv.dtype),
                   jax.ShapeDtypeStruct(gamma_v.shape, jnp.float32),
                   jax.ShapeDtypeStruct(gamma_v.shape, jnp.float32)),
        grid=(1,),
        in_specs=[x_spec, p_spec, p_spec],
        out_specs=(x_spec, p_spec, p_spec),
        compiler_params=_mosaic_params(("arbitrary",)),
        cost_estimate=cost,
    )(xv, gamma_v, beta_v)


# ----------------------------- C-sized glue (jitted) --------------------------

@functools.partial(jax.jit, static_argnames=("ch_axis",))
def _tiled_train_glue(psum, psq, shift, gamma, beta, r_mean, r_std,
                      cnt, eps, momentum, *, ch_axis):
    red = tuple(a for a in range(psum.ndim) if a != ch_axis)
    s = jnp.sum(psum, axis=red)
    sq = jnp.sum(psq, axis=red)
    mean = shift + s / cnt
    # shifted sums: sq - s^2/cnt is the exactly-centered sum of squares.
    var = jnp.maximum(sq - s * s / cnt, 0.0) / (cnt - 1.0)
    std = jnp.sqrt(var)
    new_rm = momentum * r_mean + (1.0 - momentum) * mean
    new_rs = momentum * r_std + (1.0 - momentum) * std
    scale = gamma / (std + eps)
    bias = beta - mean * scale
    return scale, bias, new_rm, new_rs


@jax.jit
def _momentum_update(r_mean, r_std, mean, std, momentum):
    return (momentum * r_mean + (1.0 - momentum) * mean,
            momentum * r_std + (1.0 - momentum) * std)


@jax.jit
def _fold_scale_bias(mean, std, gamma, beta, eps):
    scale = gamma / (std + eps)
    return scale, beta - mean * scale


# ----------------------------- module -----------------------------------------

class BatchNorm:
    """JAX/Pallas re-implementation of the PyTorch BatchNorm module (CV/BN.py).

    NOTE: like the reference nn.Module, running_mean / running_std are mutated
    as Python attributes inside __call__, so drive this object eagerly (do not
    wrap __call__ in jax.jit / scan).
    """

    def __init__(self, num_features, num_dims=4, allow_fused=True):
        if num_dims == 2:
            shape = (1, num_features)
        elif num_dims == 4:
            shape = (1, num_features, 1, 1)
        else:
            raise ValueError("num_dims must be 2 or 4")
        self.num_features = num_features
        self.num_dims = num_dims
        self.shape = shape
        self.allow_fused = allow_fused
        self.running_mean = jnp.zeros(shape, jnp.float32)
        self.running_std = jnp.ones(shape, jnp.float32)
        self.gamma = jnp.ones(shape, jnp.float32)
        self.beta = jnp.zeros(shape, jnp.float32)
        self.eps = EPS
        self.momentum = MOMENTUM

    def __call__(self, x, mode):
        C = self.num_features
        gamma = self.gamma.reshape(C).astype(jnp.float32)
        beta = self.beta.reshape(C).astype(jnp.float32)
        r_mean = self.running_mean.reshape(C).astype(jnp.float32)
        r_std = self.running_std.reshape(C).astype(jnp.float32)

        if x.ndim == 4:
            N, _, H, W = x.shape
            xv = x.reshape(N, C, H * W)   # free reshape: no transpose, C stays on sublanes
            pshape = (1, C, 1)
        elif x.ndim == 2:
            xv = x
            pshape = (1, C)
        else:
            raise ValueError("x must be rank 2 or 4")

        if mode == 'train':
            if self.allow_fused and _fused_fits(xv):
                # Fused single pass: 1 HBM read + 1 HBM write.
                y, mean, std = _fused_train(xv, gamma.reshape(pshape),
                                            beta.reshape(pshape), self.eps)
                new_rm, new_rs = _momentum_update(
                    r_mean, r_std, mean.reshape(C), std.reshape(C), self.momentum)
                self.running_mean = new_rm.reshape(self.shape)
                self.running_std = new_rs.reshape(self.shape)
                return y.reshape(x.shape)

            # Streaming two-pass path: stats sweep (1 read) + normalize (1 read + 1 write).
            shift = r_mean.reshape(pshape)  # exact-algebra shift vs. cancellation
            if x.ndim == 4:
                psum, psq = _stats_nchw(xv, shift)
            else:
                psum, psq = _stats_nc(xv, shift)
            cnt = float(xv.size // C)
            scale, bias, new_rm, new_rs = _tiled_train_glue(
                psum, psq, r_mean, gamma, beta, r_mean, r_std,
                cnt, self.eps, self.momentum, ch_axis=2)
            self.running_mean = new_rm.reshape(self.shape)
            self.running_std = new_rs.reshape(self.shape)
        else:
            scale, bias = _fold_scale_bias(r_mean, r_std, gamma, beta, self.eps)

        if x.ndim == 4:
            y = _affine_nchw(xv, scale.reshape(pshape), bias.reshape(pshape))
            return y.reshape(x.shape)
        return _affine_nc(xv, scale.reshape(pshape), bias.reshape(pshape))


# ----------------------------- reference & main --------------------------------

def _reference_bn_train(x, gamma, beta, eps=EPS):
    axes = (0, 2, 3) if x.ndim == 4 else (0,)
    m = jnp.mean(x, axis=axes, keepdims=True)
    s = jnp.std(x, axis=axes, keepdims=True, ddof=1)   # unbiased, like torch .std()
    return gamma * (x - m) / (s + eps) + beta


if __name__ == "__main__":
    key = jax.random.PRNGKey(0)
    k4, k2 = jax.random.split(key)

    # ---- 4D (NCHW) path ----
    N, C, H, W = 2, 4, 16, 16
    x = jax.random.normal(k4, (N, C, H, W), dtype=jnp.float32)
    gamma4 = jnp.arange(1, C + 1, dtype=jnp.float32).reshape(1, C, 1, 1) * 0.5
    beta4 = jnp.arange(C, dtype=jnp.float32).reshape(1, C, 1, 1) * 0.1
    y_ref = _reference_bn_train(x, gamma4, beta4)

    # (a) fused single-pass train path (activation fits in VMEM)
    bn = BatchNorm(num_features=C, num_dims=4)
    bn.gamma, bn.beta = gamma4, beta4
    y = jax.block_until_ready(bn(x, 'train'))
    assert y.shape == x.shape
    assert float(jnp.max(jnp.abs(y - y_ref))) < 1e-3, "4D fused train-mode mismatch"

    y_eval = jax.block_until_ready(bn(x, 'eval'))
    y_eval_ref = gamma4 * (x - bn.running_mean) / (bn.running_std + EPS) + beta4
    assert float(jnp.max(jnp.abs(y_eval - y_eval_ref))) < 1e-3, "4D eval-mode mismatch"

    # (b) streaming two-pass train path (forced; exercises stats + affine kernels)
    bn_t = BatchNorm(num_features=C, num_dims=4, allow_fused=False)
    bn_t.gamma, bn_t.beta = gamma4, beta4
    y_t = jax.block_until_ready(bn_t(x, 'train'))
    assert float(jnp.max(jnp.abs(y_t - y_ref))) < 1e-3, "4D tiled train-mode mismatch"
    assert float(jnp.max(jnp.abs(bn_t.running_mean - bn.running_mean))) < 1e-4
    assert float(jnp.max(jnp.abs(bn_t.running_std - bn.running_std))) < 1e-4

    # ---- 2D (N, C) path ----
    N2, C2 = 16, 32
    x2 = jax.random.normal(k2, (N2, C2), dtype=jnp.float32)
    gamma2 = jnp.linspace(0.5, 1.5, C2, dtype=jnp.float32).reshape(1, C2)
    beta2 = jnp.linspace(-0.2, 0.2, C2, dtype=jnp.float32).reshape(1, C2)
    y2_ref = _reference_bn_train(x2, gamma2, beta2)

    bn2 = BatchNorm(num_features=C2, num_dims=2)                      # fused path
    bn2.gamma, bn2.beta = gamma2, beta2
    y2 = jax.block_until_ready(bn2(x2, 'train'))
    assert float(jnp.max(jnp.abs(y2 - y2_ref))) < 1e-3, "2D fused train-mode mismatch"

    bn2t = BatchNorm(num_features=C2, num_dims=2, allow_fused=False)  # tiled path
    bn2t.gamma, bn2t.beta = gamma2, beta2
    y2t = jax.block_until_ready(bn2t(x2, 'train'))
    assert float(jnp.max(jnp.abs(y2t - y2_ref))) < 1e-3, "2D tiled train-mode mismatch"

    print("KERNEL_OK")
</pallas_src>

<mosaic_0001>
module attributes {stable_mosaic.version = 11 : i64} {
  func.func @_fused_train_kernel(%arg0: i32, %arg1: memref<2x4x256xf32, #tpu.memory_space<vmem>>, %arg2: memref<1x4x1xf32, #tpu.memory_space<vmem>>, %arg3: memref<1x4x1xf32, #tpu.memory_space<vmem>>, %arg4: memref<2x4x256xf32, #tpu.memory_space<vmem>>, %arg5: memref<1x4x1xf32, #tpu.memory_space<vmem>>, %arg6: memref<1x4x1xf32, #tpu.memory_space<vmem>>) attributes {dimension_semantics = [#tpu.dimension_semantics<arbitrary>], iteration_bounds = array<i64: 1>, scalar_prefetch = 0 : i64, scratch_operands = 0 : i64, tpu.core_type = #tpu.core_type<tc>, window_params = [{pipeline_mode = #tpu.pipeline_mode<synchronous>, transform_indices = @transform_0, window_bounds = array<i64: 2, 4, 256>}, {pipeline_mode = #tpu.pipeline_mode<synchronous>, transform_indices = @transform_1, window_bounds = array<i64: 1, 4, 1>}, {pipeline_mode = #tpu.pipeline_mode<synchronous>, transform_indices = @transform_2, window_bounds = array<i64: 1, 4, 1>}, {pipeline_mode = #tpu.pipeline_mode<synchronous>, transform_indices = @transform_3, window_bounds = array<i64: 2, 4, 256>}, {pipeline_mode = #tpu.pipeline_mode<synchronous>, transform_indices = @transform_4, window_bounds = array<i64: 1, 4, 1>}, {pipeline_mode = #tpu.pipeline_mode<synchronous>, transform_indices = @transform_5, window_bounds = array<i64: 1, 4, 1>}]} {
    %c0 = arith.constant 0 : index
    %c0_0 = arith.constant 0 : index
    %c0_1 = arith.constant 0 : index
    %0 = vector.load %arg1[%c0, %c0_0, %c0_1] : memref<2x4x256xf32, #tpu.memory_space<vmem>>, vector<2x4x256xf32>
    %cst = arith.constant dense<0.000000e+00> : vector<2x4xf32>
    %1 = vector.multi_reduction <add>, %0, %cst [2] : vector<2x4x256xf32> to vector<2x4xf32>
    %2 = vector.shape_cast %1 : vector<2x4xf32> to vector<2x4x1xf32>
    %cst_2 = arith.constant dense<0.000000e+00> : vector<4x1xf32>
    %3 = vector.multi_reduction <add>, %2, %cst_2 [0] : vector<2x4x1xf32> to vector<4x1xf32>
    %4 = vector.shape_cast %3 : vector<4x1xf32> to vector<1x4x1xf32>
    %cst_3 = arith.constant 5.120000e+02 : f32
    %5 = vector.broadcast %cst_3 : f32 to vector<1x4x1xf32>
    %6 = arith.divf %4, %5 : vector<1x4x1xf32>
    %7 = vector.broadcast %6 : vector<1x4x1xf32> to vector<2x4x256xf32>
    %8 = arith.subf %0, %7 : vector<2x4x256xf32>
    %9 = arith.mulf %8, %8 : vector<2x4x256xf32>
    %cst_4 = arith.constant dense<0.000000e+00> : vector<2x4xf32>
    %10 = vector.multi_reduction <add>, %9, %cst_4 [2] : vector<2x4x256xf32> to vector<2x4xf32>
    %11 = vector.shape_cast %10 : vector<2x4xf32> to vector<2x4x1xf32>
    %cst_5 = arith.constant dense<0.000000e+00> : vector<4x1xf32>
    %12 = vector.multi_reduction <add>, %11, %cst_5 [0] : vector<2x4x1xf32> to vector<4x1xf32>
    %13 = vector.shape_cast %12 : vector<4x1xf32> to vector<1x4x1xf32>
    %cst_6 = arith.constant 5.110000e+02 : f32
    %14 = vector.broadcast %cst_6 : f32 to vector<1x4x1xf32>
    %15 = arith.divf %13, %14 : vector<1x4x1xf32>
    %16 = math.sqrt %15 : vector<1x4x1xf32>
    %c0_7 = arith.constant 0 : index
    %c0_8 = arith.constant 0 : index
    %c0_9 = arith.constant 0 : index
    %17 = vector.load %arg5[%c0_7, %c0_8, %c0_9] : memref<1x4x1xf32, #tpu.memory_space<vmem>>, vector<1x4x1xf32>
    tpu.vector_store %arg5[%c0_7, %c0_8, %c0_9], %6 {strides = array<i32>} : memref<1x4x1xf32, #tpu.memory_space<vmem>>, vector<1x4x1xf32>,
    %c0_10 = arith.constant 0 : index
    %c0_11 = arith.constant 0 : index
    %c0_12 = arith.constant 0 : index
    %18 = vector.load %arg6[%c0_10, %c0_11, %c0_12] : memref<1x4x1xf32, #tpu.memory_space<vmem>>, vector<1x4x1xf32>
    tpu.vector_store %arg6[%c0_10, %c0_11, %c0_12], %16 {strides = array<i32>} : memref<1x4x1xf32, #tpu.memory_space<vmem>>, vector<1x4x1xf32>,
    %c0_13 = arith.constant 0 : index
    %c0_14 = arith.constant 0 : index
    %c0_15 = arith.constant 0 : index
    %19 = vector.load %arg2[%c0_13, %c0_14, %c0_15] : memref<1x4x1xf32, #tpu.memory_space<vmem>>, vector<1x4x1xf32>
    %cst_16 = arith.constant 9.99999974E-5 : f32
    %20 = vector.broadcast %cst_16 : f32 to vector<1x4x1xf32>
    %21 = arith.addf %16, %20 : vector<1x4x1xf32>
    %22 = arith.divf %19, %21 : vector<1x4x1xf32>
    %23 = vector.broadcast %22 : vector<1x4x1xf32> to vector<2x4x256xf32>
    %24 = arith.mulf %8, %23 : vector<2x4x256xf32>
    %c0_17 = arith.constant 0 : index
    %c0_18 = arith.constant 0 : index
    %c0_19 = arith.constant 0 : index
    %25 = vector.load %arg3[%c0_17, %c0_18, %c0_19] : memref<1x4x1xf32, #tpu.memory_space<vmem>>, vector<1x4x1xf32>
    %26 = vector.broadcast %25 : vector<1x4x1xf32> to vector<2x4x256xf32>
    %27 = arith.addf %24, %26 : vector<2x4x256xf32>
    %c0_20 = arith.constant 0 : index
    %c0_21 = arith.constant 0 : index
    %c0_22 = arith.constant 0 : index
    %28 = vector.load %arg4[%c0_20, %c0_21, %c0_22] : memref<2x4x256xf32, #tpu.memory_space<vmem>>, vector<2x4x256xf32>
    tpu.vector_store %arg4[%c0_20, %c0_21, %c0_22], %27 {strides = array<i32>} : memref<2x4x256xf32, #tpu.memory_space<vmem>>, vector<2x4x256xf32>,
    return
  }
  func.func @transform_0(%arg0: i32) -> (i32, i32, i32) {
    %c0_i32 = arith.constant 0 : i32
    %c0_i32_0 = arith.constant 0 : i32
    %c0_i32_1 = arith.constant 0 : i32
    %c0_i32_2 = arith.constant 0 : i32
    return %c0_i32, %c0_i32_0, %c0_i32_1 : i32, i32, i32
  }
  func.func @transform_1(%arg0: i32) -> (i32, i32, i32) {
    %c0_i32 = arith.constant 0 : i32
    %c0_i32_0 = arith.constant 0 : i32
    %c0_i32_1 = arith.constant 0 : i32
    %c0_i32_2 = arith.constant 0 : i32
    return %c0_i32, %c0_i32_0, %c0_i32_1 : i32, i32, i32
  }
  func.func @transform_2(%arg0: i32) -> (i32, i32, i32) {
    %c0_i32 = arith.constant 0 : i32
    %c0_i32_0 = arith.constant 0 : i32
    %c0_i32_1 = arith.constant 0 : i32
    %c0_i32_2 = arith.constant 0 : i32
    return %c0_i32, %c0_i32_0, %c0_i32_1 : i32, i32, i32
  }
  func.func @transform_3(%arg0: i32) -> (i32, i32, i32) {
    %c0_i32 = arith.constant 0 : i32
    %c0_i32_0 = arith.constant 0 : i32
    %c0_i32_1 = arith.constant 0 : i32
    %c0_i32_2 = arith.constant 0 : i32
    return %c0_i32, %c0_i32_0, %c0_i32_1 : i32, i32, i32
  }
  func.func @transform_4(%arg0: i32) -> (i32, i32, i32) {
    %c0_i32 = arith.constant 0 : i32
    %c0_i32_0 = arith.constant 0 : i32
    %c0_i32_1 = arith.constant 0 : i32
    %c0_i32_2 = arith.constant 0 : i32
    return %c0_i32, %c0_i32_0, %c0_i32_1 : i32, i32, i32
  }
  func.func @transform_5(%arg0: i32) -> (i32, i32, i32) {
    %c0_i32 = arith.constant 0 : i32
    %c0_i32_0 = arith.constant 0 : i32
    %c0_i32_1 = arith.constant 0 : i32
    %c0_i32_2 = arith.constant 0 : i32
    return %c0_i32, %c0_i32_0, %c0_i32_1 : i32, i32, i32
  }
}

</mosaic_0001>

<bundles_post_ra>
// kernel: tpu_custom_call.1
= control target key start
LH: loop header
LB: loop body
LE: loop exit
PB: predicated region body
PF: predicated region fallthrough
CT: control target
= control target key end

     0   :  { %11 = vsyncpa [#allocation3], 0  ;;  %s314_s0 = inlined_call_operand.hbm [shape: f32[2,4,256], index: 0, kind: input, shape index: {}]   ;;  %s315_s1 = inlined_call_operand.vmem [shape: f32[1,4,1], index: 1, kind: input, shape index: {}]   ;;  %s316_s2 = inlined_call_operand.vmem [shape: f32[1,4,1], index: 2, kind: input, shape index: {}]   ;;  %s317_s3 = inlined_call_operand.hbm [shape: f32[2,4,256], index: 3, kind: output, shape index: {0}]   ;;  %s318_s4 = inlined_call_operand.vmem [shape: f32[1,4,1], index: 4, kind: output, shape index: {1}]   ;;  %s319_s5 = inlined_call_operand.vmem [shape: f32[1,4,1], index: 5, kind: output, shape index: {2}]  }
   0x1   :  { %12 = vsyncpa [#allocation4], 0  ;;  %s222_s18 = smov [#allocation2]   ;;  %s174_s22 = scalar_lea.hbm %s314_s0, 256 }
   0x2   :  { %s18_s19 = sshll.u32 %s222_s18, 4  ;;  %p175_p0 = scmp.ne.s32.totalorder %s314_s0, %s174_s22  ;;  %s19_s19 = int_to_ptr.vmem [resolvable:$true] %s18_s19 }
   0x3   :  { %p178_p1 = scmp.lt.u32.totalorder %s174_s22, %s314_s0 }
   0x5   :  { %p180_p2 = pnand %p178_p1, %p175_p0 }
   0x7   :  { %183 = shalt.err (!%p180_p2)
}
   0x8   :  { %s184_s27 = scalar_lea.vmem %s19_s19, 256  ;;  %p189_p4 = scmp.lt.s32.totalorder %s19_s19, %s19_s19 }
   0x9   :  { %p185_p3 = scmp.ne.s32.totalorder %s19_s19, %s184_s27  ;;  %p190_p5 = scmp.lt.s32.totalorder %s184_s27, %s184_s27 }
   0xb   :  { %p191_p6 = por %p190_p5, %p189_p4 }
   0xd   :  { %p192_p7 = pnand %p191_p6, %p185_p3 }
   0xf   :  { %195 = shalt.err (!%p192_p7)
}
  0x10   :  { %s223_s28 = smov 128   ;;  %s224_s29 = smov 8  }
  0x11   :  { %24 = dma.hbm_to_vmem [thread:$0]  %s314_s0, 256, %s19_s19, [#allocation3], %s223_s28, %s223_s28, %s224_s29  }
  0x12   :  { %218 = dma.done.wait [#allocation3], 256  }
  0x13   :  { %219 = vsyncadd [#allocation3], 4294967040  ;;  %vm40_vm0 = vcmask 1043456   ;;  %v32_v0 = vld [vmem:[#allocation2] sm:$0xff]  ;;  %v33_v1 = vld [vmem:[#allocation2 + $0x8] sm:$0xff]  ;;  %v60_v12 = vlaneseq  ;;  %vm97_vm1 = vcmask 3072  }
  0x14   :  { %v36_v2 = vcombine.high %v32_v0, %v32_v0  ;;  %v41_v3 = vsel %vm40_vm0, %v32_v0, 0.0  ;;  %v37_v4 = vcombine.high %v33_v1, %v33_v1  ;;  %v46_v6 = vsel %vm40_vm0, %v33_v1, 0.0  ;;  %v118_v36 = vld [vmem:[%s316_s2] sm:$0xf]  ;;  %s227_s12 = smov [#allocation5]  }
  0x15   :  { %v225_v10 = vmov 839922192   ;;  %v61_v15 = vshrl.u32 %v60_v12, 7  ;;  %v226_v35 = vmov 0   ;;  %v100_v49 = vld [vmem:[%s315_s1] sm:$0xf] }
  0x16   :  { %v42_v5 = vsel %vm40_vm0, %v36_v2, 0.0  ;;  %v47_v7 = vsel %vm40_vm0, %v37_v4, 0.0  ;;  %v58_v11 = vunpack.c.l.s4 %v225_v10  ;;  %166 = vset.pattern.permute.xlu0 %v226_v35  ;;  %167 = vset.pattern.permute.xlu1 %v226_v35  ;;  %s140_s13 = sshll.u32 %s227_s12, 4  ;;  %s141_s13 = int_to_ptr.vmem [resolvable:$true] %s140_s13 }
  0x17   :  { %v43_v8 = vadd.f32 %v42_v5, %v41_v3  ;;  %v48_v9 = vadd.f32 %v47_v7, %v46_v6  ;;  %p201_p9 = scmp.lt.s32.totalorder %s141_s13, %s141_s13 }
  0x18   :  { %v59_v14 = vunpack.c.0.s8 %v58_v11 }
  0x19   :  { %44 = vadd.xlane.f32.xlu0 %v43_v8 }
  0x1a   :  { %v62_v19 = vsub.s32 %v59_v14, %v61_v15 }
  0x1d   :  { %49 = vadd.xlane.f32.xlu0 %v48_v9 }
  0xa6   :  { %v45_v13 = vpop.xlane.xlu0 %44 }
  0xa7   :  { %v51_v17 = vsel %vm40_vm0, %v45_v13, 0.0 }
  0xaa   :  { %v50_v16 = vpop.xlane.xlu0 %49 }
  0xab   :  { %v52_v18 = vsel %vm40_vm0, %v50_v16, 0.0 }
  0xac   :  { %v53_v20 = vadd.f32 %v52_v18, %v51_v17 }
  0xae   :  { %v55_v21 = vmul.f32 0.001953125, %v53_v20 }
  0xb0   :  { %v63_v22 = vrot.slane %v55_v21, %v62_v19  ;;  %98 = vst.msk [vmem:[%s318_s4] sm:$0xf] %vm97_vm1, %v55_v21 }
  0xb2   :  { %v66_v23 = vsub.f32 %v33_v1, %v63_v22  ;;  %v65_v24 = vsub.f32 %v32_v0, %v63_v22 }
  0xb4   :  { %v67_v25 = vmul.f32 %v65_v24, %v65_v24  ;;  %v68_v26 = vmul.f32 %v66_v23, %v66_v23 }
  0xb6   :  { %v71_v27 = vcombine.high %v67_v25, %v67_v25  ;;  %v72_v28 = vcombine.high %v68_v26, %v68_v26  ;;  %v75_v29 = vsel %vm40_vm0, %v67_v25, 0.0  ;;  %v80_v33 = vsel %vm40_vm0, %v68_v26, 0.0 }
  0xb8   :  { %v76_v30 = vsel %vm40_vm0, %v71_v27, 0.0  ;;  %v81_v32 = vsel %vm40_vm0, %v72_v28, 0.0 }
  0xb9   :  { %v77_v31 = vadd.f32 %v76_v30, %v75_v29  ;;  %v82_v34 = vadd.f32 %v81_v32, %v80_v33 }
  0xbb   :  { %78 = vadd.xlane.f32.xlu1 %v77_v31 }
  0xbf   :  { %83 = vadd.xlane.f32.xlu1 %v82_v34 }
  0xd0   :  { %121 = vperm.xlu1 %167, %v118_v36  }
 0x148   :  { %v79_v37 = vpop.xlane.xlu1 %78 }
 0x149   :  { %v85_v39 = vsel %vm40_vm0, %v79_v37, 0.0 }
 0x14c   :  { %v84_v38 = vpop.xlane.xlu1 %83 }
 0x14d   :  { %v86_v40 = vsel %vm40_vm0, %v84_v38, 0.0 }
 0x14e   :  { %v87_v41 = vadd.f32 %v86_v40, %v85_v39 }
 0x150   :  { %v89_v42 = vmul.f32 0.0019569471, %v87_v41  ;;  %v122_v52 = vpop.permute.xlu1 %121 }
 0x151   :  { %v129_v55 = vrot.slane %v122_v52, %v62_v19 }
 0x152   :  { %170 = vrsqrt.f32 %v89_v42  ;;  %vm92_vm2 = vcmp.eq.f32.partialorder %v89_v42, inf  ;;  %v95_v45 = vand.u32 2147483648, %v89_v42  ;;  %vm94_vm3 = vcmp.eq.f32.partialorder %v89_v42, 0.0 }
 0x15c   :  { %v171_v43 = vpop.eup %170 }
 0x15d   :  { %v91_v44 = vmul.f32 %v171_v43, %v89_v42 }
 0x15f   :  { %v93_v46 = vsel %vm92_vm2, %v89_v42, %v91_v44 }
 0x160   :  { %v96_v47 = vsel %vm94_vm3, %v95_v45, %v93_v46 }
 0x161   :  { %v101_v48 = vadd.f32 0.0001, %v96_v47  ;;  %99 = vst.msk [vmem:[%s319_s5] sm:$0xf] %vm97_vm1, %v96_v47  ;;  %s196_s5 = scalar_lea.vmem %s141_s13, 256 }
 0x162   :  { %p197_p8 = scmp.ne.s32.totalorder %s141_s13, %s196_s5  ;;  %p202_p10 = scmp.lt.s32.totalorder %s196_s5, %s196_s5 }
 0x163   :  { %172 = vrcp.f32 %v101_v48 }
 0x164   :  { %p203_p11 = por %p202_p10, %p201_p9 }
 0x166   :  { %p204_p12 = pnand %p203_p11, %p197_p8 }
 0x16d   :  { %v173_v50 = vpop.eup %172 }
 0x16e   :  { %v103_v51 = vmul.f32 %v173_v50, %v100_v49 }
 0x170   :  { %106 = vperm.xlu0 %166, %v103_v51  }
 0x1ef   :  { %v107_v53 = vpop.permute.xlu0 %106 }
 0x1f0   :  { %v114_v54 = vrot.slane %v107_v53, %v62_v19 }
 0x1f2   :  { %v116_v56 = vmul.f32 %v114_v54, %v65_v24  ;;  %v117_v57 = vmul.f32 %v114_v54, %v66_v23 }
 0x1f4   :  { %v131_v58 = vadd.f32 %v129_v55, %v116_v56  ;;  %v132_v59 = vadd.f32 %v129_v55, %v117_v57 }
 0x1f6   :  { %133 = vst [vmem:[#allocation5] sm:$0xff] %v131_v58  ;;  %134 = vst [vmem:[#allocation5 + $0x8] sm:$0xff] %v132_v59 }
 0x1f7   :  { %207 = shalt.err (!%p204_p12)
}
 0x1f8   :  { %s208_s15 = scalar_lea.hbm %s317_s3, 256 }
 0x1f9   :  { %p209_p13 = scmp.ne.s32.totalorder %s317_s3, %s208_s15  ;;  %p212_p0 = scmp.lt.u32.totalorder %s208_s15, %s317_s3 }
 0x1fb   :  { %p214_p1 = pnand %p212_p0, %p209_p13 }
 0x1fd   :  { %217 = shalt.err (!%p214_p1)
}
 0x1fe   :  { %146 = dma.vmem_to_hbm [thread:$0]  %s141_s13, 256, %s317_s3, [#allocation4], %s223_s28, %s223_s28, %s224_s29  }
 0x1ff   :  { %220 = dma.done.wait [#allocation4], 256  }
 0x200   :  { %221 = vsyncadd [#allocation4], 4294967040 }
 0x201   :  { %158 = vsyncpa [#allocation3], 1 }
 0x202   :  { %159 = vsyncpa [#allocation4], 1 }

</bundles_post_ra>
